<compile_context>
chip_gen: v7x
topology: tpu7x:2x2x1
jax: 0.10.0
libtpu: 0.0.40
codegen_flags: <defaults>
</compile_context>

<pallas_src>
import jax
import jax.numpy as jnp
from jax.experimental import pallas as pl
from jax.experimental.pallas import tpu as pltpu


def _norm_kernel(scale_ref, bias_ref, x_ref, o_ref):
    # x_ref / o_ref : (n_tile, 1, h_tile, W) VMEM tiles (native NCHW layout).
    # scale_ref / bias_ref : (1, 1, 1, 1) per-channel constants (broadcast splat).
    # (x - mean) / std  ==  x * (1/std) + (-mean/std)  ==  x * scale + bias
    o_ref[...] = x_ref[...] * scale_ref[...] + bias_ref[...]


def _tile_byte_budget():
    # ~2 MiB blocks: 2 arrays x 2 buffers x 2 MiB = 8 MiB fits every
    # generation's default scoped VMEM (v5e 16 MiB, v6e/v7x 32 MiB) and sits on
    # the measured HBM-roofline plateau.  On v7x (64 MiB physical VMEM,
    # ~3.2 TB/s HBM) bump to 4 MiB so the fixed per-step overhead stays hidden
    # behind the (shorter) per-step DMA time.
    budget = 2 * 1024 * 1024
    try:
        info = pltpu.get_tpu_info()
        if getattr(info, "vmem_capacity_bytes", 128 * 1024 * 1024) <= 64 * 1024 * 1024:
            budget = 4 * 1024 * 1024
    except Exception:
        pass
    return budget


def norm_layer(x, mean, std):
    """x: (N, C, H, W); mean, std: (C,). PyTorch Norm_layer.forward semantics."""
    N, C, H, W = x.shape
    itemsize = x.dtype.itemsize

    # Fold the per-channel divide into a multiply+add, computed once in f32.
    scale = (1.0 / std).astype(x.dtype).reshape(C, 1, 1, 1)
    bias = (-mean / std).astype(x.dtype).reshape(C, 1, 1, 1)

    # ---- byte-budget tile sizing (native layout: last dim W taken whole) ----
    budget = _tile_byte_budget()
    row_bytes = W * itemsize

    if H * row_bytes <= budget:
        h_tile = H
    else:
        h_tile = H  # full extent is always a legal block dim (fallback)
        t = (budget // row_bytes) // 8 * 8
        while t >= 8:
            if H % t == 0:
                h_tile = t
                break
            t -= 8

    plane_bytes = h_tile * row_bytes
    n_tile = max(1, min(N, budget // plane_bytes))
    while N % n_tile:
        n_tile -= 1

    n_steps, h_steps = N // n_tile, H // h_tile

    # ---- grid ordering: most steps first so megacore (v7x) can split it ----
    steps = {"n": n_steps, "c": C, "h": h_steps}
    order = sorted(steps, key=lambda k: -steps[k])
    pos = {name: p for p, name in enumerate(order)}
    grid = tuple(steps[name] for name in order)

    def x_map(g0, g1, g2):
        g = (g0, g1, g2)
        return (g[pos["n"]], g[pos["c"]], g[pos["h"]], 0)

    def const_map(g0, g1, g2):
        g = (g0, g1, g2)
        return (g[pos["c"]], 0, 0, 0)

    # ---- VMEM footprint guard (in + out, double-buffered, + tiny consts) ----
    block_bytes = n_tile * h_tile * W * itemsize
    live_bytes = 4 * block_bytes + (64 << 10)
    vmem_limit = None
    if live_bytes > (12 << 20):  # beyond v5e's 16 MiB default scoped headroom
        vmem_limit = min(max(live_bytes + (4 << 20), 32 << 20), 64 << 20)

    total = N * C * H * W
    # TODO(synk): if the consumer accepts bf16, emit bf16 output (1.33x less HBM
    # write traffic); kept f32 to preserve exact module semantics.
    # TODO(synk): if x is dead after this call, add input_output_aliases={2: 0}
    # to write in place; omitted here since the module returns a fresh tensor.
    out = pl.pallas_call(
        _norm_kernel,
        out_shape=jax.ShapeDtypeStruct((N, C, H, W), x.dtype),
        grid=grid,
        in_specs=[
            pl.BlockSpec((1, 1, 1, 1), const_map),          # scale (per channel)
            pl.BlockSpec((1, 1, 1, 1), const_map),          # bias  (per channel)
            pl.BlockSpec((n_tile, 1, h_tile, W), x_map),    # x tile (native NCHW)
        ],
        out_specs=pl.BlockSpec((n_tile, 1, h_tile, W), x_map),
        compiler_params=pltpu.CompilerParams(
            dimension_semantics=("parallel", "parallel", "parallel"),
            vmem_limit_bytes=vmem_limit),
        cost_estimate=pl.CostEstimate(
            flops=2 * total,
            bytes_accessed=2 * total * itemsize + 2 * C * itemsize,
            transcendentals=0),
    )(scale, bias, x)
    return out


if __name__ == "__main__":
    key = jax.random.PRNGKey(0)
    N, C, H, W = 2, 4, 16, 16

    # Deterministic per-channel normalization constants (like the mean/std
    # lists passed to Norm_layer.__init__).
    mean = jnp.array([0.485, 0.456, 0.406, 0.5], dtype=jnp.float32)
    std = jnp.array([0.229, 0.224, 0.225, 0.25], dtype=jnp.float32)

    x = jax.random.uniform(key, (N, C, H, W), dtype=jnp.float32)

    out = norm_layer(x, mean, std)
    jax.block_until_ready(out)

    # Reference: PyTorch semantics, mean/std of shape (C,1,1) broadcast over NCHW.
    ref = (x - mean[None, :, None, None]) / std[None, :, None, None]
    assert out.shape == ref.shape and out.dtype == ref.dtype
    assert jnp.allclose(out, ref, atol=1e-5, rtol=1e-6)

    print("KERNEL_OK")
</pallas_src>

<mosaic_0001>
module attributes {stable_mosaic.version = 11 : i64} {
  func.func @_norm_kernel(%arg0: i32, %arg1: i32, %arg2: i32, %arg3: memref<1x1x1x1xf32, #tpu.memory_space<vmem>>, %arg4: memref<1x1x1x1xf32, #tpu.memory_space<vmem>>, %arg5: memref<2x1x16x16xf32, #tpu.memory_space<vmem>>, %arg6: memref<2x1x16x16xf32, #tpu.memory_space<vmem>>) attributes {dimension_semantics = [#tpu.dimension_semantics<parallel>, #tpu.dimension_semantics<parallel>, #tpu.dimension_semantics<parallel>], iteration_bounds = array<i64: 4, 1, 1>, scalar_prefetch = 0 : i64, scratch_operands = 0 : i64, tpu.core_type = #tpu.core_type<tc>, window_params = [{transform_indices = @transform_0, window_bounds = array<i64: 1, 1, 1, 1>}, {transform_indices = @transform_1, window_bounds = array<i64: 1, 1, 1, 1>}, {transform_indices = @transform_2, window_bounds = array<i64: 2, 1, 16, 16>}, {transform_indices = @transform_3, window_bounds = array<i64: 2, 1, 16, 16>}]} {
    %c0 = arith.constant 0 : index
    %c0_0 = arith.constant 0 : index
    %c0_1 = arith.constant 0 : index
    %c0_2 = arith.constant 0 : index
    %0 = vector.load %arg5[%c0, %c0_0, %c0_1, %c0_2] : memref<2x1x16x16xf32, #tpu.memory_space<vmem>>, vector<2x1x16x16xf32>
    %c0_3 = arith.constant 0 : index
    %c0_4 = arith.constant 0 : index
    %c0_5 = arith.constant 0 : index
    %c0_6 = arith.constant 0 : index
    %1 = vector.load %arg3[%c0_3, %c0_4, %c0_5, %c0_6] : memref<1x1x1x1xf32, #tpu.memory_space<vmem>>, vector<1x1x1x1xf32>
    %2 = vector.broadcast %1 : vector<1x1x1x1xf32> to vector<2x1x16x16xf32>
    %3 = arith.mulf %0, %2 : vector<2x1x16x16xf32>
    %c0_7 = arith.constant 0 : index
    %c0_8 = arith.constant 0 : index
    %c0_9 = arith.constant 0 : index
    %c0_10 = arith.constant 0 : index
    %4 = vector.load %arg4[%c0_7, %c0_8, %c0_9, %c0_10] : memref<1x1x1x1xf32, #tpu.memory_space<vmem>>, vector<1x1x1x1xf32>
    %5 = vector.broadcast %4 : vector<1x1x1x1xf32> to vector<2x1x16x16xf32>
    %6 = arith.addf %3, %5 : vector<2x1x16x16xf32>
    %c0_11 = arith.constant 0 : index
    %c0_12 = arith.constant 0 : index
    %c0_13 = arith.constant 0 : index
    %c0_14 = arith.constant 0 : index
    %7 = vector.load %arg6[%c0_11, %c0_12, %c0_13, %c0_14] : memref<2x1x16x16xf32, #tpu.memory_space<vmem>>, vector<2x1x16x16xf32>
    tpu.vector_store %arg6[%c0_11, %c0_12, %c0_13, %c0_14], %6 {strides = array<i32>} : memref<2x1x16x16xf32, #tpu.memory_space<vmem>>, vector<2x1x16x16xf32>,
    return
  }
  func.func @transform_0(%arg0: i32, %arg1: i32, %arg2: i32) -> (i32, i32, i32, i32) {
    %c0_i32 = arith.constant 0 : i32
    %c0_i32_0 = arith.constant 0 : i32
    %c0_i32_1 = arith.constant 0 : i32
    %c0_i32_2 = arith.constant 0 : i32
    return %arg0, %c0_i32, %c0_i32_0, %c0_i32_1 : i32, i32, i32, i32
  }
  func.func @transform_1(%arg0: i32, %arg1: i32, %arg2: i32) -> (i32, i32, i32, i32) {
    %c0_i32 = arith.constant 0 : i32
    %c0_i32_0 = arith.constant 0 : i32
    %c0_i32_1 = arith.constant 0 : i32
    %c0_i32_2 = arith.constant 0 : i32
    return %arg0, %c0_i32, %c0_i32_0, %c0_i32_1 : i32, i32, i32, i32
  }
  func.func @transform_2(%arg0: i32, %arg1: i32, %arg2: i32) -> (i32, i32, i32, i32) {
    %c0_i32 = arith.constant 0 : i32
    %c0_i32_0 = arith.constant 0 : i32
    return %arg1, %arg0, %arg2, %c0_i32 : i32, i32, i32, i32
  }
  func.func @transform_3(%arg0: i32, %arg1: i32, %arg2: i32) -> (i32, i32, i32, i32) {
    %c0_i32 = arith.constant 0 : i32
    %c0_i32_0 = arith.constant 0 : i32
    return %arg1, %arg0, %arg2, %c0_i32 : i32, i32, i32, i32
  }
}

</mosaic_0001>

<bundles_post_ra>
// kernel: tpu_custom_call.1
= control target key start
LH: loop header
LB: loop body
LE: loop exit
PB: predicated region body
PF: predicated region fallthrough
CT: control target
= control target key end

     0   :  { %8 = vsyncpa [#allocation3], 0  ;;  %s815_s0 = inlined_call_operand.vmem [shape: f32[4,1,1,1], index: 0, kind: input, shape index: {}]   ;;  %s816_s1 = inlined_call_operand.vmem [shape: f32[4,1,1,1], index: 1, kind: input, shape index: {}]   ;;  %s817_s2 = inlined_call_operand.hbm [shape: f32[2,4,16,16], index: 2, kind: input, shape index: {}]   ;;  %s818_s3 = inlined_call_operand.hbm [shape: f32[2,4,16,16], index: 3, kind: output, shape index: {}]  }
   0x1   :  { %10 = vsyncpa [#allocation3 + $0x1], 0 }
   0x2   :  { %11 = vsyncpa [#allocation4], 0 }
   0x3   :  { %13 = vsyncpa [#allocation4 + $0x1], 0  ;;  %s671_s12 = smov 0   ;;  %s673_s13 = smov 0  }
   0x4   :  { %s675_s14 = smov 0   ;;  %s677_s15 = smov 0  }
   0x5   :  { %s679_s16 = smov 0   ;;  %s681_s17 = smov 0  }
   0x6 LB: > { %s475_s18 = sadd.s32 4294967295, %s635_s17   ;;  %s476_s19 = sadd.s32 4294967294, %s635_s17   ;;  %s635_s17 = sphi %s681_s17, %s19_s17   ;;  %s631_s16 = sphi %s679_s16, %s827_s16   ;;  %s627_s15 = sphi %s677_s15, %s826_s15   ;;  %s623_s14 = sphi %s675_s14, %s825_s14   ;;  %s619_s13 = sphi %s673_s13, %s824_s13   ;;  %s615_s12 = sphi %s671_s12, %s823_s12  }
   0x7   : > { %s38_s20 = sadd.s32 1, %s631_s16  ;;  %s101_s21 = sadd.s32 1, %s623_s14 }
   0x8   : > { %p40_p0 = scmp.ge.s32.totalorder %s38_s20, 4  ;;  %p108_p1 = scmp.ne.s32.totalorder %s623_s14, %s619_s13 }
   0x9   : > { %p109_p2 = scmp.eq.s32.totalorder %s635_s17, 0  ;;  %p114_p3 = scmp.ne.s32.totalorder %s619_s13, %s615_s12 }
   0xa   : > { %s829_s20 = smov (%p40_p0, %s38_s20), 0  ;;  %p115_p5 = scmp.eq.s32.totalorder %s475_s18, 0 }
   0xb   : > { %p712_p4 = por %p109_p2, %p108_p1  ;;  %s95_s23 = ssub.s32 %s631_s16, %s829_s20 }
   0xc   : > { %p142_p6 = scmp.eq.s32.totalorder %s475_s18, 3  ;;  %p99_p7 = scmp.eq.s32.totalorder %s95_s23, 0 }
   0xd   : > { %p718_p8 = por %p115_p5, %p114_p3  ;;  %p148_p10 = scmp.eq.s32.totalorder %s476_s19, 3 }
   0xe   : > { %p722_p9 = por %p142_p6, %p108_p1  ;;  %p478_p12 = scmp.ge.s32.totalorder %s635_s17, 4 }
   0xf   : > { %s727_s26 = scalar_select %p99_p7, %s623_s14, %s101_s21  }
  0x10   : > { %p729_p11 = por %p148_p10, %p114_p3  ;;  %164 = sbr.rel (%p478_p12) target bundleno = 36 (0x24), region = 16 }
  0x17   : > { %s180_s28 = sand.u32 1, %s623_s14   ;;  %s494_s29 = sshll.u32 %s631_s16, 8 }
  0x18   : > { %s479_s30 = sshll.u32 %s180_s28, 5  ;;  %s195_s6 = scalar_lea.hbm %s817_s2, %s494_s29 }
  0x19   : > { %s496_s7 = scalar_select %p712_p4, [#allocation0], [#allocation10] }
  0x1a   : > { %s184_s8 = scalar_lea.vmem [#allocation2], %s479_s30  ;;  %s637_s11 = smov 1024  }
  0x1b   : > { %s208_s9 = sshll.u32 %s184_s8, 4  ;;  %s200_s10 = sld [smem:[%s496_s7]]   ;;  %s209_s9 = int_to_ptr.vmem [resolvable:$true] %s208_s9 }
  0x1c   : > { %497 = sst [smem:[#allocation7]] (%p712_p4), %s637_s11  ;;  %s638_s18 = smov 256  }
  0x1d   : > { %498 = sst [smem:[#allocation7 + $0x1]] (%p712_p4), %s638_s18  ;;  %s639_s19 = smov 2  }
  0x1e   : > { %499 = sst [smem:[#allocation7 + $0x2]] (%p712_p4), %s639_s19  ;;  %s640_s21 = smov 128  }
  0x1f   : > { %500 = sst [smem:[#allocation7 + $0x3]] (%p712_p4), %s640_s21  ;;  %s641_s29 = smov 8  }
  0x20   : > { %501 = sst [smem:[#allocation7 + $0x4]] (%p712_p4), %s640_s21  ;;  %s181_s4 = scalar_lea.sflag [#allocation3], %s180_s28 }
  0x21   : > { %s482_s23 = sshll.u32 %s200_s10, 26  ;;  %502 = sst [smem:[#allocation7 + $0x5]] (%p712_p4), %s641_s29 }
  0x22   : > { %s483_s30 = sadd.s32 134217728, %s482_s23  ;;  %s642_s5 = smov [#allocation6]  }
  0x23   : > { %503 = dma.general (%p712_p4), %s195_s6, 512, %s209_s9, %s181_s4, %s642_s5, [#allocation7], %s483_s30, 0  }
  0x24 PF: > { %p484_p13 = scmp.ge.s32.totalorder %s635_s17, 1  ;;  %p229_p0 = scmp.lt.s32.totalorder %s635_s17, 5 }
  0x26   : > { %p230_p1 = pnand %p484_p13, %p229_p0 }
  0x27   : > { %s758_s7 = sand.u32 (!%p230_p1), 1, %s619_s13  }
  0x28   : > { %233 = sbr.rel (%p230_p1) target bundleno = 199 (0xc7), region = 32  ;;  %s485_s8 = sshll.u32 (!%p230_p1), %s758_s7, 5 }
  0x29   : > { %s236_s10 = scalar_lea.sflag (!%p230_p1), [#allocation3], %s758_s7  ;;  %s239_s11 = scalar_lea.vmem (!%p230_p1), [#allocation2], %s485_s8 }
  0x2f   : > { %606 = dma.done.wait (%p718_p8), %s236_s10, 512  }
  0x30   : > { %608 = vsyncadd (%p718_p8), %s236_s10, 4294966784  ;;  %p268_p2 = scmp.lt.s32.totalorder %s627_s15, 3  ;;  %v643_v0 = vmov 0   ;;  %v278_v3 = vld [vmem:[%s239_s11] sm:$0xff]  ;;  %v279_v5 = vld [vmem:[%s239_s11 + $0x8] sm:$0xff]  ;;  %vm310_vm0 = vcmask 130048  }
  0x31   : > { %580 = vset.pattern.permute.xlu0 %v643_v0  ;;  %v280_v6 = vld [vmem:[%s239_s11 + $0x10] sm:$0xff]  ;;  %v281_v7 = vld [vmem:[%s239_s11 + $0x18] sm:$0xff]  ;;  %s267_s24 = scalar_lea.vmem [#allocation5], %s485_s8  ;;  %s316_s23 = scalar_lea.sflag [#allocation4], %s758_s7 }
  0x32   : > { %s269_s22 = scalar_select %p268_p2, %s627_s15, 3 }
  0x34   : > { %s270_s9 = scalar_lea.vmem %s815_s0, %s269_s22  ;;  %s273_s21 = scalar_lea.vmem %s816_s1, %s269_s22 }
  0x35   : > { %v487_v1 = vld [vmem:[%s270_s9] ss:$0 sm:$0xff] }
  0x36   : > { %289 = vperm.xlu0 %580, %v487_v1   ;;  %v488_v2 = vld [vmem:[%s273_s21] ss:$0 sm:$0xff] }
  0x3a   : > { %303 = vperm.xlu0 %580, %v488_v2  }
  0xb5   : > { %v290_v4 = vpop.permute.xlu0 %289 }
  0xb6   : > { %v292_v8 = vmul.f32 %v290_v4, %v278_v3  ;;  %v293_v9 = vmul.f32 %v290_v4, %v279_v5  ;;  %v294_v10 = vmul.f32 %v290_v4, %v280_v6  ;;  %v295_v11 = vmul.f32 %v290_v4, %v281_v7 }
  0xb9   : > { %v304_v12 = vpop.permute.xlu0 %303 }
  0xba   : > { %v306_v13 = vadd.f32 %v304_v12, %v292_v8  ;;  %v307_v14 = vadd.f32 %v304_v12, %v293_v9  ;;  %v308_v15 = vadd.f32 %v304_v12, %v294_v10  ;;  %v309_v16 = vadd.f32 %v304_v12, %v295_v11 }
  0xbc   : > { %311 = vst.msk [vmem:[%s267_s24] sm:$0xff] %vm310_vm0, %v306_v13  ;;  %312 = vst.msk [vmem:[%s267_s24 + $0x8] sm:$0xff] %vm310_vm0, %v307_v14 }
  0xbd   : > { %313 = vst.msk [vmem:[%s267_s24 + $0x10] sm:$0xff] %vm310_vm0, %v308_v15  ;;  %314 = vst.msk [vmem:[%s267_s24 + $0x18] sm:$0xff] %vm310_vm0, %v309_v16 }
  0xbe   : > { %s495_s29 = sshll.u32 %s627_s15, 8  ;;  %s350_s30 = sshll.u32 %s267_s24, 4  ;;  %s351_s30 = int_to_ptr.vmem [resolvable:$true] %s350_s30 }
  0xbf   : > { %s333_s10 = scalar_lea.hbm %s818_s3, %s495_s29  ;;  %s644_s8 = smov 256  }
  0xc0   : > { %505 = sst [smem:[#allocation9]] (%p722_p9), %s644_s8  ;;  %s645_s11 = smov 1024  }
  0xc1   : > { %506 = sst [smem:[#allocation9 + $0x1]] (%p722_p9), %s645_s11  ;;  %s646_s7 = smov 2  }
  0xc2   : > { %507 = sst [smem:[#allocation9 + $0x2]] (%p722_p9), %s646_s7  ;;  %s647_s22 = smov 128  }
  0xc3   : > { %508 = sst [smem:[#allocation9 + $0x3]] (%p722_p9), %s647_s22  ;;  %s648_s15 = smov 8  }
  0xc4   : > { %509 = sst [smem:[#allocation9 + $0x4]] (%p722_p9), %s647_s22  ;;  %s649_s28 = smov [#allocation8]  }
  0xc5   : > { %510 = sst [smem:[#allocation9 + $0x5]] (%p722_p9), %s648_s15  ;;  %s650_s6 = smov 0  }
  0xc6   : > { %511 = dma.general (%p722_p9), %s351_s30, 512, %s333_s10, %s316_s23, %s649_s28, [#allocation9], %s650_s6, 0  }
  0xc7 PF: > { %p517_p3 = scmp.ge.s32.totalorder %s635_s17, 2  ;;  %s378_s9 = sand.u32 1, %s615_s12  }
  0xc8   : > { %s379_s18 = scalar_lea.sflag [#allocation4], %s378_s9 }
  0xc9   : > { %p514_p4 = pnand %p517_p3, %p729_p11 }
  0xcb   : > { %610 = dma.done.wait (!%p514_p4), %s379_s18, 512  }
  0xcc   : > { %612 = vsyncadd (!%p514_p4), %s379_s18, 4294966784  ;;  %s19_s17 = sadd.s32 1, %s635_s17   ;;  %s823_s12 = smov %s619_s13 }
  0xcd   : > { %p16_p5 = scmp.ge.s32.totalorder %s19_s17, 6   ;;  %s824_s13 = smov %s623_s14 }
  0xce   : > { %s825_s14 = smov %s727_s26  ;;  %s826_s15 = smov %s631_s16 }
  0xcf   : > { %s827_s16 = smov %s829_s20  ;;  %18 = sbr.rel (!%p16_p5) target bundleno = 6 (0x6), region = 93 }
  0xd6   :  { %384 = vsyncpa [#allocation3], 1 }
  0xd7   :  { %386 = vsyncpa [#allocation3 + $0x1], 1 }
  0xd8   :  { %387 = vsyncpa [#allocation4], 1 }
  0xd9   :  { %389 = vsyncpa [#allocation4 + $0x1], 1 }

</bundles_post_ra>
